<compile_context>
chip_gen: v5e
topology: v5e:2x2
jax: 0.10.0
libtpu: 0.0.40
codegen_flags: <defaults>
</compile_context>

<pallas_src>
import functools

import jax
import jax.numpy as jnp
from jax.experimental import pallas as pl
from jax.experimental.pallas import tpu as pltpu

LEAKY_SLOPE = 0.2
NEG_BIG = -1e30          # finite "-inf" used to mask padded key columns
_VMEM_LIMIT = 32 * 1024 * 1024


def _round_up(x, m):
    return (x + m - 1) // m * m


# ----------------------------------------------------------------------------
# Kernel 1: row-tiled projection.
#   Wh = X @ P_wh      (MXU, matmul dtype, f32 accumulation)
#   rc = X @ P_rc      (f32; rc[:, 0] = r, rc[:, 1] = c)
# ----------------------------------------------------------------------------
def _proj_kernel(x_ref, pwh_ref, prc_ref, wh_ref, rc_ref):
    x = x_ref[...]                                          # (TM, K_pad) f32
    wh = jnp.dot(x.astype(pwh_ref.dtype), pwh_ref[...],
                 preferred_element_type=jnp.float32)
    wh_ref[...] = wh.astype(wh_ref.dtype)
    rc_ref[...] = jnp.dot(x, prc_ref[...],
                          preferred_element_type=jnp.float32)


# ----------------------------------------------------------------------------
# Kernel 2: flash-style online-softmax attention over (row-block, col-block).
# ----------------------------------------------------------------------------
def _attn_kernel(r_ref, c_ref, wh_ref, o_ref, m_sc, l_sc, acc_sc,
                 *, approx_recip):
    j = pl.program_id(1)

    @pl.when(j == 0)
    def _():
        m_sc[...] = jnp.full_like(m_sc, -jnp.inf)
        l_sc[...] = jnp.zeros_like(l_sc)
        acc_sc[...] = jnp.zeros_like(acc_sc)

    # e[i, j] = r[i] + c[j]  — plain VPU broadcast add, no concat / K=2 matmul.
    e = r_ref[...] + c_ref[...]                             # (TM, TN) f32
    e = jnp.where(e > 0, e, LEAKY_SLOPE * e)                # LeakyReLU(0.2)

    m_prev = m_sc[...]
    m_new = jnp.maximum(m_prev, jnp.max(e, axis=1, keepdims=True))
    alpha = jnp.exp(m_prev - m_new)
    p = jnp.exp(e - m_new)

    l_sc[...] = alpha * l_sc[...] + jnp.sum(p, axis=1, keepdims=True)
    acc_sc[...] = alpha * acc_sc[...] + jnp.dot(
        p.astype(wh_ref.dtype), wh_ref[...],
        preferred_element_type=jnp.float32)
    m_sc[...] = m_new

    @pl.when(j == pl.num_programs(1) - 1)
    def _():
        inv_l = pl.reciprocal(l_sc[...], approx=approx_recip)
        hp = acc_sc[...] * inv_l
        # ELU (alpha=1).  exp(x)-1 kept (guaranteed Mosaic lowering); abs
        # error vs expm1 is negligible at f32 tolerances.
        o_ref[...] = jnp.where(hp > 0, hp, jnp.exp(hp) - 1.0).astype(o_ref.dtype)


# ----------------------------------------------------------------------------
# Wrapper
# ----------------------------------------------------------------------------
def spatial_attention_forward(h, pos, W, a, *, precise=False,
                              block_rows=256, block_cols=512):
    """SpatialAttentionLayer eval-mode forward.

    h: (N, Fin); pos: (N, 1, 3); W: (Fin, Fout); a: (2*Fout + 3, 1).
    precise=True  -> f32 MXU operands + exact reciprocal (tight-check mode).
    precise=False -> bf16 MXU operands (f32 accumulation) + approx reciprocal.
    """
    f32 = jnp.float32
    N, Fin = h.shape
    Fout = W.shape[1]

    h = h.astype(f32)
    W = W.astype(f32)
    a = a.astype(f32)
    pos2 = pos.reshape(N, 3).astype(f32)
    a1 = a[:Fout]                 # weights Wh[j]  (column / neighbour node)
    a2 = a[Fout:2 * Fout]         # weights Wh[i]  (row node)
    a3 = a[2 * Fout:]             # weights pos[i] - pos[j]

    mm_dtype = f32 if precise else jnp.bfloat16

    # -------- padded, lane-dense shapes & tile selection --------------------
    block_cols = _round_up(block_cols, 128)
    block_rows = _round_up(block_rows, 8)
    K = Fin + 3
    K_pad = _round_up(K, 128)
    F_pad = _round_up(Fout, 128)
    n128 = _round_up(N, 128)
    TN = min(block_cols, n128)                        # key tile (lane axis)
    TM = block_rows if TN % block_rows == 0 else TN   # row tile; divides TN
    N_pad = _round_up(N, TN)                          # TM | TN | N_pad

    # X = [h | pos | 0], kept f32 so the (r, c) scores stay full precision;
    # it is cast to mm_dtype only for the Wh matmul inside the kernel.
    X = jnp.zeros((N_pad, K_pad), f32)
    X = X.at[:N, :Fin].set(h)
    X = X.at[:N, Fin:Fin + 3].set(pos2)

    # Wh projection, zero-padded to (K_pad, F_pad) (padded cols/rows are 0).
    P_wh = jnp.zeros((K_pad, F_pad), mm_dtype)
    P_wh = P_wh.at[:Fin, :Fout].set(W.astype(mm_dtype))

    # Fused skinny projections (one matmul instead of three 1-lane matmuls):
    #   r = Wh·a2 + pos·a3 = X @ [W@a2 ; a3]
    #   c = Wh·a1 - pos·a3 = X @ [W@a1 ; -a3]
    P_rc = jnp.zeros((K_pad, 2), f32)
    P_rc = P_rc.at[:Fin, 0:1].set(W @ a2)
    P_rc = P_rc.at[Fin:Fin + 3, 0:1].set(a3)
    P_rc = P_rc.at[:Fin, 1:2].set(W @ a1)
    P_rc = P_rc.at[Fin:Fin + 3, 1:2].set(-a3)

    # -------- kernel 1: projection ------------------------------------------
    wh, rc = pl.pallas_call(
        _proj_kernel,
        out_shape=(jax.ShapeDtypeStruct((N_pad, F_pad), mm_dtype),
                   jax.ShapeDtypeStruct((N_pad, 2), f32)),
        grid=(N_pad // TM,),
        in_specs=[pl.BlockSpec((TM, K_pad), lambda i: (i, 0)),
                  pl.BlockSpec((K_pad, F_pad), lambda i: (0, 0)),
                  pl.BlockSpec((K_pad, 2), lambda i: (0, 0))],
        out_specs=(pl.BlockSpec((TM, F_pad), lambda i: (i, 0)),
                   pl.BlockSpec((TM, 2), lambda i: (i, 0))),
        compiler_params=pltpu.CompilerParams(
            dimension_semantics=("parallel",),
            vmem_limit_bytes=_VMEM_LIMIT),
    )(X, P_wh, P_rc)

    # Row scores stay an (N_pad, 1) column; column scores become a lane-dense
    # (1, N_pad) row (one tiny transpose, amortized over all row tiles), with
    # padded key columns masked so they receive zero softmax weight.
    r = rc[:, 0:1]
    c_row = rc[:, 1:2].reshape(1, N_pad)
    key_ids = jnp.arange(N_pad, dtype=jnp.int32).reshape(1, N_pad)
    c_row = jnp.where(key_ids < N, c_row, jnp.float32(NEG_BIG))

    # -------- kernel 2: tiled online-softmax attention ----------------------
    out = pl.pallas_call(
        functools.partial(_attn_kernel, approx_recip=not precise),
        out_shape=jax.ShapeDtypeStruct((N_pad, F_pad), f32),
        grid=(N_pad // TM, N_pad // TN),
        in_specs=[pl.BlockSpec((TM, 1), lambda i, j: (i, 0)),
                  pl.BlockSpec((1, TN), lambda i, j: (0, j)),
                  pl.BlockSpec((TN, F_pad), lambda i, j: (j, 0))],
        out_specs=pl.BlockSpec((TM, F_pad), lambda i, j: (i, 0)),
        scratch_shapes=[pltpu.VMEM((TM, 1), f32),
                        pltpu.VMEM((TM, 1), f32),
                        pltpu.VMEM((TM, F_pad), f32)],
        compiler_params=pltpu.CompilerParams(
            dimension_semantics=("parallel", "arbitrary"),
            vmem_limit_bytes=_VMEM_LIMIT),
    )(r, c_row, wh)

    # TODO(synk): F.dropout(p=0.6, training=True) on the attention matrix is
    # stochastic; this kernel implements the deterministic eval-mode forward.
    return out[:N, :Fout]


# ----------------------------------------------------------------------------
# Reference & test
# ----------------------------------------------------------------------------
def _xavier_uniform(key, shape, gain):
    fan_in, fan_out = shape[0], shape[1]
    bound = gain * (6.0 / (fan_in + fan_out)) ** 0.5
    return jax.random.uniform(key, shape, jnp.float32, -bound, bound)


def _reference_forward(h, pos, W, a):
    N = h.shape[0]
    Fout = W.shape[1]
    Wh = h @ W
    a1, a2, a3 = a[:Fout], a[Fout:2 * Fout], a[2 * Fout:]
    p = pos.reshape(N, 3) @ a3                               # (N, 1)
    e = (Wh @ a1).reshape(1, N) + (Wh @ a2) + p - p.reshape(1, N)
    e = jnp.where(e > 0, e, LEAKY_SLOPE * e)
    attn = jax.nn.softmax(e, axis=1)
    hp = attn @ Wh
    return jnp.where(hp > 0, hp, jnp.exp(hp) - 1.0)


if __name__ == "__main__":
    N, IN_FEATURES, OUT_FEATURES = 8, 16, 32

    key = jax.random.PRNGKey(0)
    kW, ka, kh, kp = jax.random.split(key, 4)

    # deterministic parameter init (matches nn.init.xavier_uniform_, gain=1.414)
    W = _xavier_uniform(kW, (IN_FEATURES, OUT_FEATURES), 1.414)
    a = _xavier_uniform(ka, (2 * OUT_FEATURES + 3, 1), 1.414)

    h = jax.random.normal(kh, (N, IN_FEATURES), jnp.float32)
    pos = jax.random.normal(kp, (N, 1, 3), jnp.float32)

    ref = _reference_forward(h, pos, W, a)

    # Precise path (f32 MXU, exact reciprocal): tight numerical check.
    out_precise = jax.block_until_ready(
        spatial_attention_forward(h, pos, W, a, precise=True))
    assert out_precise.shape == (N, OUT_FEATURES)
    assert jnp.allclose(out_precise, ref, atol=1e-4, rtol=1e-4), float(
        jnp.max(jnp.abs(out_precise - ref)))

    # Fast path (bf16 MXU operands, f32 accumulation, approx reciprocal):
    # loose sanity check against the f32 reference.
    out_fast = jax.block_until_ready(
        spatial_attention_forward(h, pos, W, a, precise=False))
    assert out_fast.shape == (N, OUT_FEATURES)
    assert jnp.allclose(out_fast, ref, atol=1e-1, rtol=1e-1), float(
        jnp.max(jnp.abs(out_fast - ref)))

    print("KERNEL_OK")
</pallas_src>

<mosaic_0001>
module attributes {stable_mosaic.version = 11 : i64} {
  func.func @_proj_kernel(%arg0: i32, %arg1: memref<128x128xf32, #tpu.memory_space<vmem>>, %arg2: memref<128x128xf32, #tpu.memory_space<vmem>>, %arg3: memref<128x2xf32, #tpu.memory_space<vmem>>, %arg4: memref<128x128xf32, #tpu.memory_space<vmem>>, %arg5: memref<128x2xf32, #tpu.memory_space<vmem>>) attributes {dimension_semantics = [#tpu.dimension_semantics<parallel>], iteration_bounds = array<i64: 1>, scalar_prefetch = 0 : i64, scratch_operands = 0 : i64, tpu.core_type = #tpu.core_type<tc>, window_params = [{transform_indices = @transform_0, window_bounds = array<i64: 128, 128>}, {pipeline_mode = #tpu.pipeline_mode<synchronous>, transform_indices = @transform_1, window_bounds = array<i64: 128, 128>}, {pipeline_mode = #tpu.pipeline_mode<synchronous>, transform_indices = @transform_2, window_bounds = array<i64: 128, 2>}, {transform_indices = @transform_3, window_bounds = array<i64: 128, 128>}, {transform_indices = @transform_4, window_bounds = array<i64: 128, 2>}]} {
    %c0 = arith.constant 0 : index
    %c0_0 = arith.constant 0 : index
    %0 = vector.load %arg1[%c0, %c0_0] : memref<128x128xf32, #tpu.memory_space<vmem>>, vector<128x128xf32>
    %c0_1 = arith.constant 0 : index
    %c0_2 = arith.constant 0 : index
    %1 = vector.load %arg2[%c0_1, %c0_2] : memref<128x128xf32, #tpu.memory_space<vmem>>, vector<128x128xf32>
    %cst = arith.constant dense<0.000000e+00> : vector<128x128xf32>
    %2 = tpu.matmul %0, %1, %cst {dimension_numbers = #tpu.dot_dimension_numbers<[1], [0], [0], [1], [0, 0, 1, 1], [], []>} : vector<128x128xf32>, vector<128x128xf32>, vector<128x128xf32> -> vector<128x128xf32>
    %c0_3 = arith.constant 0 : index
    %c0_4 = arith.constant 0 : index
    %3 = vector.load %arg4[%c0_3, %c0_4] : memref<128x128xf32, #tpu.memory_space<vmem>>, vector<128x128xf32>
    tpu.vector_store %arg4[%c0_3, %c0_4], %2 {strides = array<i32>} : memref<128x128xf32, #tpu.memory_space<vmem>>, vector<128x128xf32>,
    %c0_5 = arith.constant 0 : index
    %c0_6 = arith.constant 0 : index
    %4 = vector.load %arg3[%c0_5, %c0_6] : memref<128x2xf32, #tpu.memory_space<vmem>>, vector<128x2xf32>
    %cst_7 = arith.constant dense<0.000000e+00> : vector<128x2xf32>
    %5 = tpu.matmul %0, %4, %cst_7 {dimension_numbers = #tpu.dot_dimension_numbers<[1], [0], [0], [1], [0, 0, 1, 1], [], []>} : vector<128x128xf32>, vector<128x2xf32>, vector<128x2xf32> -> vector<128x2xf32>
    %c0_8 = arith.constant 0 : index
    %c0_9 = arith.constant 0 : index
    %6 = vector.load %arg5[%c0_8, %c0_9] : memref<128x2xf32, #tpu.memory_space<vmem>>, vector<128x2xf32>
    tpu.vector_store %arg5[%c0_8, %c0_9], %5 {strides = array<i32>} : memref<128x2xf32, #tpu.memory_space<vmem>>, vector<128x2xf32>,
    return
  }
  func.func @transform_0(%arg0: i32) -> (i32, i32) {
    %c0_i32 = arith.constant 0 : i32
    %c0_i32_0 = arith.constant 0 : i32
    return %arg0, %c0_i32 : i32, i32
  }
  func.func @transform_1(%arg0: i32) -> (i32, i32) {
    %c0_i32 = arith.constant 0 : i32
    %c0_i32_0 = arith.constant 0 : i32
    %c0_i32_1 = arith.constant 0 : i32
    return %c0_i32, %c0_i32_0 : i32, i32
  }
  func.func @transform_2(%arg0: i32) -> (i32, i32) {
    %c0_i32 = arith.constant 0 : i32
    %c0_i32_0 = arith.constant 0 : i32
    %c0_i32_1 = arith.constant 0 : i32
    return %c0_i32, %c0_i32_0 : i32, i32
  }
  func.func @transform_3(%arg0: i32) -> (i32, i32) {
    %c0_i32 = arith.constant 0 : i32
    %c0_i32_0 = arith.constant 0 : i32
    return %arg0, %c0_i32 : i32, i32
  }
  func.func @transform_4(%arg0: i32) -> (i32, i32) {
    %c0_i32 = arith.constant 0 : i32
    %c0_i32_0 = arith.constant 0 : i32
    return %arg0, %c0_i32 : i32, i32
  }
}

</mosaic_0001>

<bundles_post_ra>
// kernel: tpu_custom_call.1
= control target key start
LH: loop header
LB: loop body
LE: loop exit
PB: predicated region body
PF: predicated region fallthrough
CT: control target
= control target key end

     0   :  { %10 = vsyncpa [#allocation3], 0  ;;  %s556_s0 = inlined_call_operand.vmem [shape: f32[128,128], index: 0, kind: input, shape index: {}]   ;;  %s557_s1 = inlined_call_operand.hbm [shape: f32[128,128], index: 1, kind: input, shape index: {}]   ;;  %s558_s2 = inlined_call_operand.vmem [shape: f32[128,2], index: 2, kind: input, shape index: {}]   ;;  %s559_s3 = inlined_call_operand.hbm [shape: f32[128,128], index: 3, kind: output, shape index: {0}]   ;;  %s560_s4 = inlined_call_operand.vmem [shape: f32[128,2], index: 4, kind: output, shape index: {1}]  }
   0x1   :  { %11 = vsyncpa [#allocation4], 0  ;;  %s18_s17 = sshll.u32 %s557_s1, 4  ;;  %s355_s18 = smov [#allocation2]   ;;  %s19_s17 = int_to_ptr.hbm [resolvable:$true] %s18_s17 }
   0x2   :  { %s20_s19 = sshll.u32 %s355_s18, 4  ;;  %s356_s20 = smov 128   ;;  %s21_s19 = int_to_ptr.vmem [resolvable:$true] %s20_s19 }
   0x3   :  { %s357_s21 = smov 8  }
   0x4   :  { %26 = dma.hbm_to_vmem [thread:$0]  %s19_s17, 2048, %s21_s19, [#allocation3], %s356_s20, %s356_s20, %s357_s21  }
   0x5   :  { %351 = dma.done.wait [#allocation3], 2048  }
   0x6   :  { %352 = vsyncadd [#allocation3], 4294965248  ;;  %v64_v0 = vld [vmem:[#allocation2 + $0x78] sm:$0xff]  ;;  %v63_v2 = vld [vmem:[#allocation2 + $0x70] sm:$0xff]  ;;  %vm227_vm0 = vcmask 15360   ;;  %s358_s8 = smov [#allocation5]  }
   0x7   :  { %v161_v1 = vld [vmem:[%s558_s2 + $0x78] sm:$0xff]  ;;  %267 = vmatpush.msra.mxu2 %v64_v0  ;;  %v160_v3 = vld [vmem:[%s558_s2 + $0x70] sm:$0xff]  ;;  %v62_v4 = vld [vmem:[#allocation2 + $0x68] sm:$0xff]  ;;  %65 = vmatpush.msra.mxu0 %v64_v0  ;;  %s248_s9 = sshll.u32 %s358_s8, 4  ;;  %s250_s11 = sshll.u32 %s559_s3, 4  ;;  %s249_s9 = int_to_ptr.vmem [resolvable:$true] %s248_s9  ;;  %s251_s11 = int_to_ptr.hbm [resolvable:$true] %s250_s11 }
   0x8   :  { %283 = vmatpush.msra.mxu3 %v161_v1  ;;  %v159_v5 = vld [vmem:[%s558_s2 + $0x68] sm:$0xff]  ;;  %162 = vmatpush.msra.mxu1 %v161_v1  ;;  %v61_v6 = vld [vmem:[#allocation2 + $0x60] sm:$0xff]  ;;  %v60_v8 = vld [vmem:[#allocation2 + $0x58] sm:$0xff] }
   0x9   :  { %268 = vmatpush.msra.mxu2 %v63_v2  ;;  %v158_v7 = vld [vmem:[%s558_s2 + $0x60] sm:$0xff]  ;;  %66 = vmatpush.msra.mxu0 %v63_v2  ;;  %v157_v9 = vld [vmem:[%s558_s2 + $0x58] sm:$0xff]  ;;  %v59_v10 = vld [vmem:[#allocation2 + $0x50] sm:$0xff] }
   0xa   :  { %284 = vmatpush.msra.mxu3 %v160_v3  ;;  %163 = vmatpush.msra.mxu1 %v160_v3  ;;  %v156_v11 = vld [vmem:[%s558_s2 + $0x50] sm:$0xff]  ;;  %v58_v12 = vld [vmem:[#allocation2 + $0x48] sm:$0xff]  ;;  %v57_v14 = vld [vmem:[#allocation2 + $0x40] sm:$0xff] }
   0xb   :  { %269 = vmatpush.msra.mxu2 %v62_v4  ;;  %67 = vmatpush.msra.mxu0 %v62_v4  ;;  %v155_v13 = vld [vmem:[%s558_s2 + $0x48] sm:$0xff]  ;;  %v154_v15 = vld [vmem:[%s558_s2 + $0x40] sm:$0xff]  ;;  %v56_v16 = vld [vmem:[#allocation2 + $0x38] sm:$0xff] }
   0xc   :  { %285 = vmatpush.msra.mxu3 %v159_v5  ;;  %164 = vmatpush.msra.mxu1 %v159_v5  ;;  %v153_v17 = vld [vmem:[%s558_s2 + $0x38] sm:$0xff]  ;;  %v55_v18 = vld [vmem:[#allocation2 + $0x30] sm:$0xff]  ;;  %v54_v20 = vld [vmem:[#allocation2 + $0x28] sm:$0xff] }
   0xd   :  { %270 = vmatpush.msra.mxu2 %v61_v6  ;;  %68 = vmatpush.msra.mxu0 %v61_v6  ;;  %v152_v19 = vld [vmem:[%s558_s2 + $0x30] sm:$0xff]  ;;  %v151_v21 = vld [vmem:[%s558_s2 + $0x28] sm:$0xff]  ;;  %v53_v22 = vld [vmem:[#allocation2 + $0x20] sm:$0xff] }
   0xe   :  { %286 = vmatpush.msra.mxu3 %v158_v7  ;;  %165 = vmatpush.msra.mxu1 %v158_v7  ;;  %v150_v23 = vld [vmem:[%s558_s2 + $0x20] sm:$0xff]  ;;  %v52_v24 = vld [vmem:[#allocation2 + $0x18] sm:$0xff]  ;;  %v51_v26 = vld [vmem:[#allocation2 + $0x10] sm:$0xff] }
   0xf   :  { %271 = vmatpush.msra.mxu2 %v60_v8  ;;  %69 = vmatpush.msra.mxu0 %v60_v8  ;;  %v149_v25 = vld [vmem:[%s558_s2 + $0x18] sm:$0xff]  ;;  %v148_v27 = vld [vmem:[%s558_s2 + $0x10] sm:$0xff]  ;;  %v50_v28 = vld [vmem:[#allocation2 + $0x8] sm:$0xff] }
  0x10   :  { %287 = vmatpush.msra.mxu3 %v157_v9  ;;  %166 = vmatpush.msra.mxu1 %v157_v9  ;;  %v147_v29 = vld [vmem:[%s558_s2 + $0x8] sm:$0xff]  ;;  %v49_v30 = vld [vmem:[#allocation2] sm:$0xff]  ;;  %v43_v36 = vld [vmem:[%s556_s0 + $0x50] sm:$0xff] }
  0x11   :  { %272 = vmatpush.msra.mxu2 %v59_v10  ;;  %70 = vmatpush.msra.mxu0 %v59_v10  ;;  %v146_v31 = vld [vmem:[%s558_s2] sm:$0xff]  ;;  %v42_v34 = vld [vmem:[%s556_s0 + $0x48] sm:$0xff]  ;;  %v35_v37 = vld [vmem:[%s556_s0 + $0x10] sm:$0xff] }
  0x12   :  { %288 = vmatpush.msra.mxu3 %v156_v11  ;;  %167 = vmatpush.msra.mxu1 %v156_v11  ;;  %v41_v32 = vld [vmem:[%s556_s0 + $0x40] sm:$0xff]  ;;  %v34_v35 = vld [vmem:[%s556_s0 + $0x8] sm:$0xff]  ;;  %v44_v38 = vld [vmem:[%s556_s0 + $0x58] sm:$0xff] }
  0x13   :  { %273 = vmatpush.msra.mxu2 %v58_v12  ;;  %71 = vmatpush.msra.mxu0 %v58_v12  ;;  %v33_v33 = vld [vmem:[%s556_s0] sm:$0xff]  ;;  %v36_v39 = vld [vmem:[%s556_s0 + $0x18] sm:$0xff]  ;;  %v46_v42 = vld [vmem:[%s556_s0 + $0x68] sm:$0xff] }
  0x14   :  { %289 = vmatpush.msra.mxu3 %v155_v13  ;;  %168 = vmatpush.msra.mxu1 %v155_v13  ;;  %v45_v40 = vld [vmem:[%s556_s0 + $0x60] sm:$0xff]  ;;  %v38_v43 = vld [vmem:[%s556_s0 + $0x28] sm:$0xff]  ;;  %v47_v44 = vld [vmem:[%s556_s0 + $0x70] sm:$0xff] }
  0x15   :  { %274 = vmatpush.msra.mxu2 %v57_v14  ;;  %72 = vmatpush.msra.mxu0 %v57_v14  ;;  %v37_v41 = vld [vmem:[%s556_s0 + $0x20] sm:$0xff]  ;;  %v39_v45 = vld [vmem:[%s556_s0 + $0x30] sm:$0xff]  ;;  %v48_v46 = vld [vmem:[%s556_s0 + $0x78] sm:$0xff] }
  0x16   :  { %290 = vmatpush.msra.mxu3 %v154_v15  ;;  %169 = vmatpush.msra.mxu1 %v154_v15  ;;  %v40_v47 = vld [vmem:[%s556_s0 + $0x38] sm:$0xff] }
  0x17   :  { %275 = vmatpush.msra.mxu2 %v56_v16  ;;  %73 = vmatpush.msra.mxu0 %v56_v16 }
  0x18   :  { %291 = vmatpush.msra.mxu3 %v153_v17  ;;  %170 = vmatpush.msra.mxu1 %v153_v17 }
  0x19   :  { %276 = vmatpush.msra.mxu2 %v55_v18  ;;  %74 = vmatpush.msra.mxu0 %v55_v18 }
  0x1a   :  { %292 = vmatpush.msra.mxu3 %v152_v19  ;;  %171 = vmatpush.msra.mxu1 %v152_v19 }
  0x1b   :  { %277 = vmatpush.msra.mxu2 %v54_v20  ;;  %75 = vmatpush.msra.mxu0 %v54_v20 }
  0x1c   :  { %293 = vmatpush.msra.mxu3 %v151_v21  ;;  %172 = vmatpush.msra.mxu1 %v151_v21 }
  0x1d   :  { %278 = vmatpush.msra.mxu2 %v53_v22  ;;  %76 = vmatpush.msra.mxu0 %v53_v22 }
  0x1e   :  { %294 = vmatpush.msra.mxu3 %v150_v23  ;;  %173 = vmatpush.msra.mxu1 %v150_v23 }
  0x1f   :  { %279 = vmatpush.msra.mxu2 %v52_v24  ;;  %77 = vmatpush.msra.mxu0 %v52_v24 }
  0x20   :  { %295 = vmatpush.msra.mxu3 %v149_v25  ;;  %174 = vmatpush.msra.mxu1 %v149_v25 }
  0x21   :  { %280 = vmatpush.msra.mxu2 %v51_v26  ;;  %78 = vmatpush.msra.mxu0 %v51_v26 }
  0x22   :  { %296 = vmatpush.msra.mxu3 %v148_v27  ;;  %175 = vmatpush.msra.mxu1 %v148_v27 }
  0x23   :  { %281 = vmatpush.msra.mxu2 %v50_v28  ;;  %79 = vmatpush.msra.mxu0 %v50_v28 }
  0x24   :  { %297 = vmatpush.msra.mxu3 %v147_v29  ;;  %176 = vmatpush.msra.mxu1 %v147_v29 }
  0x25   :  { %282 = vmatpush.msra.mxu2 %v49_v30  ;;  %80 = vmatpush.msra.mxu0 %v49_v30 }
  0x26   :  { %298 = vmatpush.msra.mxu3 %v146_v31  ;;  %105 = vmatmul.f32.vlgmr.msra.gmra.mxu2 %v41_v32 }
  0x27   :  { %202 = vmatmul.f32.vlgmr.msra.gmra.mxu3 %v41_v32  ;;  %177 = vmatpush.msra.mxu1 %v146_v31 }
  0x28   :  { %81 = vmatmul.f32.vlgmr.msra.gmra.mxu0 %v33_v33  ;;  %178 = vmatmul.f32.vlgmr.msra.gmra.mxu1 %v33_v33 }
  0x2e   :  { %108 = vmatmul.f32.gmra.mxu2 %v42_v34 }
  0x2f   :  { %205 = vmatmul.f32.gmra.mxu3 %v42_v34 }
  0x30   :  { %84 = vmatmul.f32.gmra.mxu0 %v34_v35  ;;  %181 = vmatmul.f32.gmra.mxu1 %v34_v35 }
  0x36   :  { %111 = vmatmul.f32.gmra.mxu2 %v43_v36 }
  0x37   :  { %208 = vmatmul.f32.gmra.mxu3 %v43_v36 }
  0x38   :  { %87 = vmatmul.f32.gmra.mxu0 %v35_v37  ;;  %184 = vmatmul.f32.gmra.mxu1 %v35_v37 }
  0x3e   :  { %114 = vmatmul.f32.gmra.mxu2 %v44_v38 }
  0x3f   :  { %211 = vmatmul.f32.gmra.mxu3 %v44_v38 }
  0x40   :  { %90 = vmatmul.f32.gmra.mxu0 %v36_v39  ;;  %187 = vmatmul.f32.gmra.mxu1 %v36_v39 }
  0x46   :  { %117 = vmatmul.f32.gmra.mxu2 %v45_v40 }
  0x47   :  { %214 = vmatmul.f32.gmra.mxu3 %v45_v40 }
  0x48   :  { %93 = vmatmul.f32.gmra.mxu0 %v37_v41  ;;  %190 = vmatmul.f32.gmra.mxu1 %v37_v41 }
  0x4e   :  { %120 = vmatmul.f32.gmra.mxu2 %v46_v42 }
  0x4f   :  { %217 = vmatmul.f32.gmra.mxu3 %v46_v42 }
  0x50   :  { %96 = vmatmul.f32.gmra.mxu0 %v38_v43  ;;  %193 = vmatmul.f32.gmra.mxu1 %v38_v43 }
  0x56   :  { %123 = vmatmul.f32.gmra.mxu2 %v47_v44 }
  0x57   :  { %220 = vmatmul.f32.gmra.mxu3 %v47_v44 }
  0x58   :  { %99 = vmatmul.f32.gmra.mxu0 %v39_v45  ;;  %196 = vmatmul.f32.gmra.mxu1 %v39_v45 }
  0x5e   :  { %126 = vmatmul.f32.gmra.mxu2 %v48_v46 }
  0x5f   :  { %223 = vmatmul.f32.gmra.mxu3 %v48_v46 }
  0x60   :  { %102 = vmatmul.f32.gmra.mxu0 %v40_v47  ;;  %199 = vmatmul.f32.gmra.mxu1 %v40_v47 }
  0xa5   :  { %v82_v48 = vpop.f32.mrf.mxu0  ;;  %v179_v49 = vpop.f32.mrf.mxu1 }
  0xa6   :  { %130 = vst [vmem:[#allocation5] sm:$0xff] %v82_v48 }
  0xa7   :  { %228 = vst.msk [vmem:[%s560_s4] sm:$0xff] %vm227_vm0, %v179_v49 }
  0xa9   :  { %v106_v50 = vpop.f32.mrf.mxu2 }
  0xaa   :  { %v203_v51 = vpop.f32.mrf.mxu3  ;;  %138 = vst [vmem:[#allocation5 + $0x40] sm:$0xff] %v106_v50 }
  0xab   :  { %236 = vst.msk [vmem:[%s560_s4 + $0x40] sm:$0xff] %vm227_vm0, %v203_v51 }
  0xad   :  { %v85_v52 = vpop.f32.mrf.mxu0  ;;  %v182_v53 = vpop.f32.mrf.mxu1 }
  0xae   :  { %131 = vst [vmem:[#allocation5 + $0x8] sm:$0xff] %v85_v52 }
  0xaf   :  { %229 = vst.msk [vmem:[%s560_s4 + $0x8] sm:$0xff] %vm227_vm0, %v182_v53 }
  0xb1   :  { %v109_v54 = vpop.f32.mrf.mxu2 }
  0xb2   :  { %v206_v55 = vpop.f32.mrf.mxu3  ;;  %139 = vst [vmem:[#allocation5 + $0x48] sm:$0xff] %v109_v54 }
  0xb3   :  { %237 = vst.msk [vmem:[%s560_s4 + $0x48] sm:$0xff] %vm227_vm0, %v206_v55 }
  0xb5   :  { %v88_v56 = vpop.f32.mrf.mxu0  ;;  %v185_v57 = vpop.f32.mrf.mxu1 }
  0xb6   :  { %132 = vst [vmem:[#allocation5 + $0x10] sm:$0xff] %v88_v56 }
  0xb7   :  { %230 = vst.msk [vmem:[%s560_s4 + $0x10] sm:$0xff] %vm227_vm0, %v185_v57 }
  0xb9   :  { %v112_v58 = vpop.f32.mrf.mxu2 }
  0xba   :  { %v209_v59 = vpop.f32.mrf.mxu3  ;;  %140 = vst [vmem:[#allocation5 + $0x50] sm:$0xff] %v112_v58 }
  0xbb   :  { %238 = vst.msk [vmem:[%s560_s4 + $0x50] sm:$0xff] %vm227_vm0, %v209_v59 }
  0xbd   :  { %v91_v60 = vpop.f32.mrf.mxu0  ;;  %v188_v61 = vpop.f32.mrf.mxu1 }
  0xbe   :  { %133 = vst [vmem:[#allocation5 + $0x18] sm:$0xff] %v91_v60 }
  0xbf   :  { %231 = vst.msk [vmem:[%s560_s4 + $0x18] sm:$0xff] %vm227_vm0, %v188_v61 }
  0xc1   :  { %v115_v62 = vpop.f32.mrf.mxu2 }
  0xc2   :  { %v212_v63 = vpop.f32.mrf.mxu3  ;;  %141 = vst [vmem:[#allocation5 + $0x58] sm:$0xff] %v115_v62 }
  0xc3   :  { %239 = vst.msk [vmem:[%s560_s4 + $0x58] sm:$0xff] %vm227_vm0, %v212_v63 }
  0xc5   :  { %v94_v0 = vpop.f32.mrf.mxu0  ;;  %v191_v1 = vpop.f32.mrf.mxu1 }
  0xc6   :  { %134 = vst [vmem:[#allocation5 + $0x20] sm:$0xff] %v94_v0 }
  0xc7   :  { %232 = vst.msk [vmem:[%s560_s4 + $0x20] sm:$0xff] %vm227_vm0, %v191_v1 }
  0xc9   :  { %v118_v2 = vpop.f32.mrf.mxu2 }
  0xca   :  { %v215_v3 = vpop.f32.mrf.mxu3  ;;  %142 = vst [vmem:[#allocation5 + $0x60] sm:$0xff] %v118_v2 }
  0xcb   :  { %240 = vst.msk [vmem:[%s560_s4 + $0x60] sm:$0xff] %vm227_vm0, %v215_v3 }
  0xcd   :  { %v97_v4 = vpop.f32.mrf.mxu0  ;;  %v194_v5 = vpop.f32.mrf.mxu1 }
  0xce   :  { %135 = vst [vmem:[#allocation5 + $0x28] sm:$0xff] %v97_v4 }
  0xcf   :  { %233 = vst.msk [vmem:[%s560_s4 + $0x28] sm:$0xff] %vm227_vm0, %v194_v5 }
  0xd1   :  { %v121_v6 = vpop.f32.mrf.mxu2 }
  0xd2   :  { %v218_v7 = vpop.f32.mrf.mxu3  ;;  %143 = vst [vmem:[#allocation5 + $0x68] sm:$0xff] %v121_v6 }
  0xd3   :  { %241 = vst.msk [vmem:[%s560_s4 + $0x68] sm:$0xff] %vm227_vm0, %v218_v7 }
  0xd5   :  { %v100_v8 = vpop.f32.mrf.mxu0  ;;  %v197_v9 = vpop.f32.mrf.mxu1 }
  0xd6   :  { %136 = vst [vmem:[#allocation5 + $0x30] sm:$0xff] %v100_v8 }
  0xd7   :  { %234 = vst.msk [vmem:[%s560_s4 + $0x30] sm:$0xff] %vm227_vm0, %v197_v9 }
  0xd9   :  { %v124_v10 = vpop.f32.mrf.mxu2 }
  0xda   :  { %v221_v11 = vpop.f32.mrf.mxu3  ;;  %144 = vst [vmem:[#allocation5 + $0x70] sm:$0xff] %v124_v10 }
  0xdb   :  { %242 = vst.msk [vmem:[%s560_s4 + $0x70] sm:$0xff] %vm227_vm0, %v221_v11 }
  0xdd   :  { %v103_v12 = vpop.f32.mrf.mxu0  ;;  %v200_v13 = vpop.f32.mrf.mxu1 }
  0xde   :  { %137 = vst [vmem:[#allocation5 + $0x38] sm:$0xff] %v103_v12 }
  0xdf   :  { %235 = vst.msk [vmem:[%s560_s4 + $0x38] sm:$0xff] %vm227_vm0, %v200_v13 }
  0xe1   :  { %v127_v14 = vpop.f32.mrf.mxu2 }
  0xe2   :  { %v224_v15 = vpop.f32.mrf.mxu3  ;;  %145 = vst [vmem:[#allocation5 + $0x78] sm:$0xff] %v127_v14 }
  0xe3   :  { %243 = vst.msk [vmem:[%s560_s4 + $0x78] sm:$0xff] %vm227_vm0, %v224_v15 }
  0xe4   :  { %256 = dma.vmem_to_hbm [thread:$0]  %s249_s9, 2048, %s251_s11, [#allocation4], %s356_s20, %s356_s20, %s357_s21  }
  0xe5   :  { %353 = dma.done.wait [#allocation4], 2048  }
  0xe6   :  { %354 = vsyncadd [#allocation4], 4294965248 }
  0xe7   :  { %265 = vsyncpa [#allocation3], 1 }
  0xe8   :  { %266 = vsyncpa [#allocation4], 1 }

</bundles_post_ra>
